<compile_context>
chip_gen: v5e
topology: v5e:2x2
jax: 0.10.0
libtpu: 0.0.40
codegen_flags: <defaults>
</compile_context>

<pallas_src>
import functools

import jax
import jax.numpy as jnp
from jax.experimental import pallas as pl
from jax.experimental.pallas import tpu as pltpu

_MIB = 1024 * 1024
_LANE = 128


def _vmem_budget_and_limit():
    """Generation-aware VMEM plan: (tile-plan budget, scoped vmem_limit_bytes)."""
    try:
        cap = int(pltpu.get_tpu_info().vmem_capacity_bytes)
    except Exception:
        cap = 64 * _MIB  # conservative (v7x-sized) fallback
    # v7x (64 MiB physical): limit ~56 MiB, plan budget ~48 MiB.
    # v5e/v6e (128 MiB):     limit ~96 MiB, plan budget ~88 MiB.
    limit = min(cap * 7 // 8, 96 * _MIB)
    budget = max(limit - 8 * _MIB, 16 * _MIB)
    return budget, limit


def _sublane_packing(itemsize):
    # f32 -> 8 rows/vreg, bf16 -> 16, int8/fp8 -> 32.
    return max(8, 32 // max(int(itemsize), 1))


def _choose_row_tile(n, c, itemsize, budget_bytes):
    """Row tile sized by target bytes/step (DMA amortization), capped by VMEM."""
    pack = _sublane_packing(itemsize)

    # Target ~4 MiB of native-dtype input per grid step (measured tile sweeps
    # put >=~85% of HBM roofline at multi-MiB tiles vs ~29% at tiny tiles).
    target_tile_bytes = 4 * _MIB
    tn_target = max(target_tile_bytes // max(c * itemsize, 1), pack)

    # VMEM cap per row:
    #   2x double-buffered logits tile (native dtype)
    #   ~6 live f32 (TN, C) temporaries (x, xs, exp(xs), iota, one-hot, f32 casts)
    #   2x double-buffered (TN, 1) int32 target tile  -> lane-padded to 128
    #   ~6 (TN, 1) f32 per-row reductions/temps        -> lane-padded to 128
    per_row = (2 * c * itemsize) + (6 * c * 4) + (2 * _LANE * 4) + (6 * _LANE * 4)
    tn_vmem = budget_bytes // max(per_row, 1)

    tn = int(min(tn_target, tn_vmem))
    # Never exceed the (packing-padded) batch; keep sublane-packing alignment.
    n_padded = ((max(n, 1) + pack - 1) // pack) * pack
    tn = min(tn, n_padded)
    tn = max(pack, (tn // pack) * pack)
    return tn


def _compute_dtype_for(dtype):
    """bf16 elementwise math only where the VPU/EUP natively supports it."""
    if jnp.dtype(dtype) == jnp.dtype(jnp.bfloat16):
        try:
            kind = jax.devices()[0].device_kind.lower()
        except Exception:
            kind = ""
        if ("v6" in kind) or ("v7" in kind):   # v5e has no bf16 VPU/EUP
            return jnp.bfloat16
    return jnp.float32


def _focal_loss_kernel(logits_ref, target_ref, out_ref, *, gamma, n_true, tn,
                       compute_dtype):
    i = pl.program_id(0)

    x = logits_ref[...].astype(compute_dtype)          # (TN, C)
    t = target_ref[...]                                 # (TN, 1) int32
    rows, c = x.shape

    # Numerically stable log-softmax pieces; reuse (x - m) for both paths.
    m = jnp.max(x, axis=-1, keepdims=True)                                  # (TN, 1)
    xs = x - m                                                              # (TN, C)
    # Per-row reductions accumulate in f32 regardless of compute dtype.
    sum_exp = jnp.sum(jnp.exp(xs).astype(jnp.float32), axis=-1,
                      keepdims=True)                                        # (TN, 1)

    # One-hot gather of the target-class (shifted) logit: no dynamic gather on TPU.
    cls_ids = jax.lax.broadcasted_iota(jnp.int32, (rows, c), 1)             # (TN, C)
    tgt_shift = jnp.sum(
        jnp.where(cls_ids == t, xs, jnp.zeros_like(xs)).astype(jnp.float32),
        axis=-1, keepdims=True)                                             # (TN, 1)

    # logpt = logsumexp(x) - x[target] = log(sum_exp) - (x[target] - m) >= 0.
    logpt = jnp.maximum(jnp.log(sum_exp) - tgt_shift, 0.0)                  # (TN, 1)
    pt = jnp.exp(-logpt)
    one_minus_pt = jnp.maximum(1.0 - pt, 0.0)

    # (1 - pt) ** gamma without float-pow (two EUP transcendentals + NaN hazard)
    # for the common integer gammas.
    if gamma == 0.0:
        w = jnp.ones_like(one_minus_pt)
    elif float(gamma).is_integer() and 1 <= int(gamma) <= 4:
        w = one_minus_pt
        for _ in range(int(gamma) - 1):
            w = w * one_minus_pt
    else:
        w = jnp.power(one_minus_pt, gamma)

    loss = w * logpt                                                        # (TN, 1)

    # Mask rows past the true batch size (last partial tile reads padding).
    row_ids = i * tn + jax.lax.broadcasted_iota(jnp.int32, (rows, 1), 0)    # (TN, 1)
    loss = jnp.where(row_ids < n_true, loss, 0.0)

    # Per-block partial SUM (not mean) -> lane-dense (1, 128) output row.
    partial = jnp.sum(loss).reshape(1, 1)
    out_ref[...] = jnp.broadcast_to(partial, out_ref.shape).astype(out_ref.dtype)


def focal_loss(logits, target, gamma=1.0):
    """logits: (N, C) float (f32/bf16), target: (N,) int class ids -> scalar f32."""
    n, c = logits.shape
    target2d = target.reshape(n, 1).astype(jnp.int32)

    budget, vmem_limit = _vmem_budget_and_limit()
    itemsize = jnp.dtype(logits.dtype).itemsize
    tn = _choose_row_tile(n, c, itemsize, budget)
    grid = pl.cdiv(n, tn)

    kernel = functools.partial(
        _focal_loss_kernel, gamma=float(gamma), n_true=n, tn=tn,
        compute_dtype=_compute_dtype_for(logits.dtype))

    partials = pl.pallas_call(
        kernel,
        out_shape=jax.ShapeDtypeStruct((grid, 128), jnp.float32),
        grid=(grid,),
        in_specs=[
            pl.BlockSpec((tn, c), lambda i: (i, 0)),   # logits row tile (native dtype)
            pl.BlockSpec((tn, 1), lambda i: (i, 0)),   # targets row tile
        ],
        out_specs=pl.BlockSpec((1, 128), lambda i: (i, 0)),
        compiler_params=pltpu.CompilerParams(
            dimension_semantics=("parallel",),
            vmem_limit_bytes=int(vmem_limit),
        ),
    )(logits, target2d)

    # Final reduction over per-block partial sums in plain JAX; divide by true N.
    return jnp.sum(partials[:, 0]) / jnp.float32(n)


def _reference_focal_loss(logits, target, gamma=1.0):
    # Pure-JAX reference for correctness checking.
    logp = jax.nn.log_softmax(logits.astype(jnp.float32), axis=-1)
    logpt = -jnp.take_along_axis(logp, target.reshape(-1, 1), axis=-1)[:, 0]
    pt = jnp.exp(-logpt)
    return jnp.mean((1.0 - pt) ** gamma * logpt)


if __name__ == "__main__":
    key = jax.random.PRNGKey(0)
    k1, k2 = jax.random.split(key)

    N, C = 8, 32                      # small shapes: batch=8, classes=32
    logits = jax.random.normal(k1, (N, C), dtype=jnp.float32)
    target = jax.random.randint(k2, (N,), 0, C, dtype=jnp.int32)

    for g in (0.0, 1.0, 1.5, 2.0):
        loss = jax.block_until_ready(focal_loss(logits, target, gamma=g))
        ref = _reference_focal_loss(logits, target, gamma=g)
        assert jnp.allclose(loss, ref, atol=1e-5, rtol=1e-5), (g, float(loss), float(ref))

    # bf16 smoke test (on v6e/v7x the kernel keeps elementwise math in bf16).
    logits_bf16 = logits.astype(jnp.bfloat16)
    loss_b = jax.block_until_ready(focal_loss(logits_bf16, target, gamma=2.0))
    ref_b = _reference_focal_loss(logits_bf16.astype(jnp.float32), target, gamma=2.0)
    assert jnp.allclose(loss_b, ref_b, atol=1e-1, rtol=3e-2), (float(loss_b), float(ref_b))

    print("KERNEL_OK")
</pallas_src>

<mosaic_0001>
module attributes {stable_mosaic.version = 11 : i64} {
  func.func @_focal_loss_kernel(%arg0: i32, %arg1: memref<8x32xf32, #tpu.memory_space<vmem>>, %arg2: memref<8x1xi32, #tpu.memory_space<vmem>>, %arg3: memref<1x128xf32, #tpu.memory_space<vmem>>) attributes {dimension_semantics = [#tpu.dimension_semantics<parallel>], iteration_bounds = array<i64: 1>, scalar_prefetch = 0 : i64, scratch_operands = 0 : i64, tpu.core_type = #tpu.core_type<tc>, window_params = [{transform_indices = @transform_0, window_bounds = array<i64: 8, 32>}, {transform_indices = @transform_1, window_bounds = array<i64: 8, 1>}, {transform_indices = @transform_2, window_bounds = array<i64: 1, 128>}]} {
    %c0 = arith.constant 0 : index
    %c0_0 = arith.constant 0 : index
    %0 = vector.load %arg1[%c0, %c0_0] : memref<8x32xf32, #tpu.memory_space<vmem>>, vector<8x32xf32>
    %c0_1 = arith.constant 0 : index
    %c0_2 = arith.constant 0 : index
    %1 = vector.load %arg2[%c0_1, %c0_2] : memref<8x1xi32, #tpu.memory_space<vmem>>, vector<8x1xi32>
    %cst = arith.constant dense<0xFF800000> : vector<8xf32>
    %2 = vector.multi_reduction <maximumf>, %0, %cst [1] : vector<8x32xf32> to vector<8xf32>
    %3 = vector.shape_cast %2 : vector<8xf32> to vector<8x1xf32>
    %4 = vector.broadcast %3 : vector<8x1xf32> to vector<8x32xf32>
    %5 = arith.subf %0, %4 : vector<8x32xf32>
    %6 = math.exp %5 : vector<8x32xf32>
    %cst_3 = arith.constant dense<0.000000e+00> : vector<8xf32>
    %7 = vector.multi_reduction <add>, %6, %cst_3 [1] : vector<8x32xf32> to vector<8xf32>
    %8 = vector.shape_cast %7 : vector<8xf32> to vector<8x1xf32>
    %9 = tpu.iota {dimensions = array<i32: 1>} : vector<8x32xi32>
    %10 = vector.broadcast %1 : vector<8x1xi32> to vector<8x32xi32>
    %11 = arith.cmpi eq, %9, %10 : vector<8x32xi32>
    %cst_4 = arith.constant 0.000000e+00 : f32
    %12 = vector.broadcast %cst_4 : f32 to vector<8x32xf32>
    %13 = arith.select %11, %5, %12 : vector<8x32xi1>, vector<8x32xf32>
    %cst_5 = arith.constant dense<0.000000e+00> : vector<8xf32>
    %14 = vector.multi_reduction <add>, %13, %cst_5 [1] : vector<8x32xf32> to vector<8xf32>
    %15 = vector.shape_cast %14 : vector<8xf32> to vector<8x1xf32>
    %16 = math.log %8 : vector<8x1xf32>
    %17 = arith.subf %16, %15 : vector<8x1xf32>
    %cst_6 = arith.constant 0.000000e+00 : f32
    %18 = vector.broadcast %cst_6 : f32 to vector<8x1xf32>
    %19 = arith.maximumf %17, %18 : vector<8x1xf32>
    %cst_7 = arith.constant 1.000000e+00 : f32
    %20 = vector.broadcast %cst_7 : f32 to vector<8x1xf32>
    %21 = arith.mulf %20, %19 : vector<8x1xf32>
    %c8_i32 = arith.constant 8 : i32
    %22 = arith.muli %arg0, %c8_i32 : i32
    %23 = tpu.iota {dimensions = array<i32: 0>} : vector<8x1xi32>
    %24 = vector.broadcast %22 : i32 to vector<8x1xi32>
    %25 = arith.addi %24, %23 : vector<8x1xi32>
    %c8_i32_8 = arith.constant 8 : i32
    %26 = vector.broadcast %c8_i32_8 : i32 to vector<8x1xi32>
    %27 = arith.cmpi slt, %25, %26 : vector<8x1xi32>
    %cst_9 = arith.constant 0.000000e+00 : f32
    %28 = vector.broadcast %cst_9 : f32 to vector<8x1xf32>
    %29 = arith.select %27, %21, %28 : vector<8x1xi1>, vector<8x1xf32>
    %30 = vector.shape_cast %29 : vector<8x1xf32> to vector<1x8x1xf32>
    %cst_10 = arith.constant dense<0.000000e+00> : vector<1xf32>
    %31 = vector.multi_reduction <add>, %30, %cst_10 [1, 2] : vector<1x8x1xf32> to vector<1xf32>
    %32 = vector.shape_cast %31 : vector<1xf32> to vector<1x1x1xf32>
    %33 = vector.extract %32[0, 0, 0] : f32 from vector<1x1x1xf32>
    %34 = vector.broadcast %33 : f32 to vector<1x1xf32>
    %35 = vector.shape_cast %34 : vector<1x1xf32> to vector<1x1xf32>
    %36 = vector.broadcast %35 : vector<1x1xf32> to vector<1x128xf32>
    %c0_11 = arith.constant 0 : index
    %c0_12 = arith.constant 0 : index
    %37 = vector.load %arg3[%c0_11, %c0_12] : memref<1x128xf32, #tpu.memory_space<vmem>>, vector<1x128xf32>
    tpu.vector_store %arg3[%c0_11, %c0_12], %36 {strides = array<i32>} : memref<1x128xf32, #tpu.memory_space<vmem>>, vector<1x128xf32>,
    return
  }
  func.func @transform_0(%arg0: i32) -> (i32, i32) {
    %c0_i32 = arith.constant 0 : i32
    %c0_i32_0 = arith.constant 0 : i32
    return %arg0, %c0_i32 : i32, i32
  }
  func.func @transform_1(%arg0: i32) -> (i32, i32) {
    %c0_i32 = arith.constant 0 : i32
    %c0_i32_0 = arith.constant 0 : i32
    return %arg0, %c0_i32 : i32, i32
  }
  func.func @transform_2(%arg0: i32) -> (i32, i32) {
    %c0_i32 = arith.constant 0 : i32
    %c0_i32_0 = arith.constant 0 : i32
    return %arg0, %c0_i32 : i32, i32
  }
}

</mosaic_0001>

<bundles_post_ra>
// kernel: tpu_custom_call.1
= control target key start
LH: loop header
LB: loop body
LE: loop exit
PB: predicated region body
PF: predicated region fallthrough
CT: control target
= control target key end

     0   :  { %vm14_vm0 = vcmask 261120   ;;  %s138_s0 = inlined_call_operand.vmem [shape: f32[8,32], index: 0, kind: input, shape index: {}]   ;;  %s139_s1 = inlined_call_operand.vmem [shape: s32[8,1], index: 1, kind: input, shape index: {}]   ;;  %s140_s2 = inlined_call_operand.hbm [shape: f32[1,128], index: 2, kind: output, shape index: {}]  }
   0x1   :  { %v12_v0 = vld [vmem:[%s138_s0] sm:$0xff] }
   0x2   :  { %7 = vsyncpa [#allocation3], 0  ;;  %v15_v1 = vsel %vm14_vm0, %v12_v0, -inf  ;;  %v109_v2 = vmov 0   ;;  %v13_v3 = vld [vmem:[%s139_s1] sm:$0xff]  ;;  %v24_v9 = vlaneseq  ;;  %vm45_vm2 = vcmask 7168  }
   0x3   :  { %78 = vset.pattern.permute.xlu0 %v109_v2  ;;  %s110_s0 = smov [#allocation2]   ;;  %s65_s15 = sshll.u32 %s140_s2, 4  ;;  %s66_s15 = int_to_ptr.hbm [resolvable:$true] %s65_s15 }
   0x4   :  { %16 = vmax.xlane.f32.xlu0 %v15_v1  ;;  %v25_v10 = vand.u32 127, %v24_v9  ;;  %s63_s1 = sshll.u32 %s110_s0, 4  ;;  %s64_s1 = int_to_ptr.vmem [resolvable:$true] %s63_s1 }
  0x18   :  { %27 = vperm.xlu0 %78, %v13_v3  }
  0x77   :  { %v17_v4 = vpop.xlane.xlu0 %16 }
  0x78   :  { %v18_v5 = vsub.f32 %v12_v0, %v17_v4 }
  0x7a   :  { %v19_v6 = vmul.f32 1.442695, %v18_v5 }
  0x7c   :  { %79 = vpow2.f32 %v19_v6 }
  0x82   :  { %v80_v7 = vpop.eup %79 }
  0x83   :  { %v21_v8 = vsel %vm14_vm0, %v80_v7, 0.0 }
  0x84   :  { %22 = vadd.xlane.f32.xlu1 %v21_v8 }
  0x8a   :  { %v28_v11 = vpop.permute.xlu0 %27 }
  0x8b   :  { %vm29_vm1 = vcmp.eq.s32.totalorder %v25_v10, %v28_v11 }
  0x8c   :  { %v30_v12 = vsel %vm29_vm1, %v18_v5, 0.0 }
  0x8d   :  { %v31_v13 = vsel %vm14_vm0, %v30_v12, 0.0 }
  0x8e   :  { %32 = vadd.xlane.f32.xlu1 %v31_v13 }
  0xf7   :  { %v23_v14 = vpop.xlane.xlu1 %22 }
  0xf8   :  { %81 = vlog2.f32 %v23_v14 }
  0xfe   :  { %v82_v15 = vpop.eup %81 }
  0xff   :  { %v35_v16 = vmul.f32 0.6931472, %v82_v15 }
 0x101   :  { %v33_v17 = vpop.xlane.xlu1 %32 }
 0x102   :  { %v36_v18 = vsub.f32 %v35_v16, %v33_v17 }
 0x104   :  { %v37_v19 = vmax.f32 %v36_v18, 0.0 }
 0x106   :  { %v46_v20 = vsel %vm45_vm2, %v37_v19, 0.0 }
 0x107   :  { %47 = vadd.xlane.f32.xlu2 %v46_v20 }
 0x17a   :  { %v48_v21 = vpop.xlane.xlu2 %47 }
 0x17b   :  { %v49_v22 = vrot.slane %v48_v21, 4 }
 0x17d   :  { %v50_v23 = vadd.f32 %v49_v22, %v48_v21 }
 0x17f   :  { %v51_v24 = vrot.slane %v50_v23, 2 }
 0x181   :  { %v52_v25 = vadd.f32 %v51_v24, %v50_v23 }
 0x183   :  { %v53_v26 = vrot.slane %v52_v25, 1 }
 0x185   :  { %v54_v27 = vadd.f32 %v53_v26, %v52_v25 }
 0x187   :  { %74 = vpush %v54_v27 }
 0x1b8   :  { %s75_s16 = spop %74 }
 0x1b9   :  { %v56_v28 = vstv %s75_s16 }
 0x1ba   :  { %57 = vst [vmem:[#allocation2] sm:$0x1] %v56_v28 }
 0x1bb   :  { %68 = dma.vmem_to_hbm [thread:$0]  %s64_s1, 16, %s66_s15, [#allocation3]  }
 0x1bc   :  { %107 = dma.done.wait [#allocation3], 16  }
 0x1bd   :  { %108 = vsyncadd [#allocation3], 4294967280 }
 0x1be   :  { %73 = vsyncpa [#allocation3], 1 }

</bundles_post_ra>
